<compile_context>
chip_gen: v7x
topology: tpu7x:2x2x1
jax: 0.10.0
libtpu: 0.0.40
codegen_flags: <defaults>
</compile_context>

<pallas_src>
import functools
import numpy as np
import jax
import jax.numpy as jnp
from jax.experimental import pallas as pl
from jax.experimental.pallas import tpu as pltpu


# ----------------------------------------------------------------------------- kernel
def _gcn_kernel(x_ref, a_ref, w1_ref, b1_ref, w2_ref, b2_ref, g_ref, o_ref):
    """Single grid step == whole batch. gc1 -> ReLU -> (dropout=id) -> gc2 -> log_softmax."""
    a = a_ref[...]                                      # [BN, BN]      bf16
    x = x_ref[...]                                      # [BN, T*Cin]   bf16

    # ---- gc1: neighbor aggregation (adj) then per-timestep Linear over channels, then ReLU
    ax = jnp.dot(a, x, preferred_element_type=jnp.float32)                     # [BN, T*Cin]
    h = jnp.dot(ax.astype(jnp.bfloat16), w1_ref[...],
                preferred_element_type=jnp.float32) + b1_ref[...]              # [BN, T*H]
    h = jnp.maximum(h, 0.0)                                                     # ReLU (f32, VPU)
    # TODO(synk): F.dropout is identity here (inference mode); training-mode RNG dropout
    #             is not implemented in-kernel (would need pltpu.prng_* masking).

    # ---- gc2, re-associated: A @ (h @ W2big).  Mathematically identical to (A @ h) @ W2big
    # (adj acts on rows, W on columns) but the second matmul now has N=128 instead of N=512.
    hw = jnp.dot(h.astype(jnp.bfloat16), w2_ref[...],
                 preferred_element_type=jnp.float32)                            # [BN, T*O]
    y = jnp.dot(a, hw.astype(jnp.bfloat16),
                preferred_element_type=jnp.float32) + b2_ref[...]               # [BN, T*O]

    # ---- log_softmax over the class sub-axis (groups of O inside the 128-lane (t, o) axis).
    # Any per-row shift cancels exactly, so the cheap whole-row max is used for stability; the
    # per-(t) group sums come from ONE bf16 MXU matmul with the block-diagonal-ones matrix.
    # (At these logit scales the cross-timestep spread is << 88, so exp() never underflows; a
    #  per-group max would be needed only for pathologically spread logits.)
    m = jnp.max(y, axis=-1, keepdims=True)                                      # [BN, 1]
    e = jnp.exp(y - m)
    s = jnp.dot(e.astype(jnp.bfloat16), g_ref[...],
                preferred_element_type=jnp.float32)                             # group-sum bcast
    o_ref[...] = ((y - m) - jnp.log(s)).astype(o_ref.dtype)


# ----------------------------------------------------------------------------- wrapper
def make_gcn_forward(params, adj, *, B, Cin, N, T):
    """One-time setup: pack weights/adjacency into MXU-friendly constants, build a jitted
    forward(x) where x-repack + pallas_call + output permute fuse into a single dispatch.
    x: [B, Cin, N, T] (matches the PyTorch module), adj: [N, N]. forward returns [B, O, N, T]."""
    H, O = params['w1'].shape[0], params['w2'].shape[0]
    BN, TC, TH, TO = B * N, T * Cin, T * H, T * O

    f32 = jnp.float32
    i_t = jnp.eye(T, dtype=f32)
    # Weight-derived constants computed ONCE (not per call); bf16 MXU operands, f32 biases.
    abig = jnp.kron(jnp.eye(B, dtype=f32), adj.astype(f32)).astype(jnp.bfloat16)   # [BN, BN]
    w1big = jnp.kron(i_t, params['w1'].T).astype(jnp.bfloat16)                     # [TC, TH]
    w2big = jnp.kron(i_t, params['w2'].T).astype(jnp.bfloat16)                     # [TH, TO]
    b1big = jnp.tile(params['b1'], T)[None, :].astype(f32)                         # [1, TH]
    b2big = jnp.tile(params['b2'], T)[None, :].astype(f32)                         # [1, TO]
    g = jnp.kron(i_t, jnp.ones((O, O), f32)).astype(jnp.bfloat16)                  # [TO, TO]

    def full(shape):
        return pl.BlockSpec(shape, lambda i, _r=len(shape): (0,) * _r)

    call = pl.pallas_call(
        _gcn_kernel,
        out_shape=jax.ShapeDtypeStruct((BN, TO), jnp.float32),
        grid=(1,),   # whole batch in one step: amortizes per-step overhead at this tiny size
        in_specs=[full((BN, TC)), full((BN, BN)),
                  full((TC, TH)), full((1, TH)),
                  full((TH, TO)), full((1, TO)), full((TO, TO))],
        out_specs=full((BN, TO)),
        compiler_params=pltpu.CompilerParams(dimension_semantics=("arbitrary",)),
    )

    @jax.jit
    def forward(x):
        # rows (b, n), cols (t, c); bf16 MXU operand.  Lives inside the same jit as the
        # pallas_call and the output permute -> one dispatch end-to-end.
        x2 = jnp.transpose(x, (0, 2, 3, 1)).reshape(BN, TC).astype(jnp.bfloat16)
        y2 = call(x2, abig, w1big, b1big, w2big, b2big, g)
        return y2.reshape(B, N, T, O).transpose(0, 3, 1, 2)     # back to [B, O, N, T]

    return forward


# ----------------------------------------------------------------------------- params / reference
def init_params(key, nfeat, nhid, nclass):
    ks = jax.random.split(key, 4)

    def u(k, shape, fan_in):  # PyTorch nn.Linear-style U(-1/sqrt(fan_in), 1/sqrt(fan_in))
        b = 1.0 / np.sqrt(fan_in)
        return jax.random.uniform(k, shape, jnp.float32, -b, b)

    return dict(w1=u(ks[0], (nhid, nfeat), nfeat), b1=u(ks[1], (nhid,), nfeat),
                w2=u(ks[2], (nclass, nhid), nhid), b2=u(ks[3], (nclass,), nhid))


def reference_forward(x, adj, params):
    """Pure-JAX f32 replica of GCN.forward (eval mode) for correctness checking."""
    ax = jnp.einsum('nm,bcmt->bcnt', adj, x)
    h = jnp.einsum('bcnt,hc->bhnt', ax, params['w1']) + params['b1'][None, :, None, None]
    h = jax.nn.relu(h)
    ah = jnp.einsum('nm,bhmt->bhnt', adj, h)
    y = jnp.einsum('bhnt,oh->bont', ah, params['w2']) + params['b2'][None, :, None, None]
    return jax.nn.log_softmax(y, axis=1)


# ----------------------------------------------------------------------------- main
if __name__ == "__main__":
    B, Cin, N, T = 2, 4, 16, 16       # x: [batch, nfeat, nodes, time]
    nhid, nclass = 32, 8              # GCN(nfeat=4, nhid=32, output=8, dropout=0.5)

    key = jax.random.PRNGKey(0)
    kp, kx, ka = jax.random.split(key, 3)
    params = init_params(kp, Cin, nhid, nclass)

    x = jax.random.normal(kx, (B, Cin, N, T), jnp.float32)
    adj_raw = jax.random.uniform(ka, (N, N), jnp.float32)
    adj = adj_raw / jnp.sum(adj_raw, axis=1, keepdims=True)    # row-normalized adjacency

    gcn_forward = make_gcn_forward(params, adj, B=B, Cin=Cin, N=N, T=T)
    out = jax.block_until_ready(gcn_forward(x))

    ref = reference_forward(x, adj, params)
    # tolerance accommodates bf16 MXU operands (f32 accumulation) incl. the bf16 group-sum
    np.testing.assert_allclose(np.asarray(out), np.asarray(ref), rtol=2e-2, atol=2e-2)
    print("KERNEL_OK")
</pallas_src>

<mosaic_0001>
module attributes {stable_mosaic.version = 11 : i64} {
  func.func @_gcn_kernel(%arg0: i32, %arg1: memref<32x64xbf16, #tpu.memory_space<vmem>>, %arg2: memref<32x32xbf16, #tpu.memory_space<vmem>>, %arg3: memref<64x512xbf16, #tpu.memory_space<vmem>>, %arg4: memref<1x512xf32, #tpu.memory_space<vmem>>, %arg5: memref<512x128xbf16, #tpu.memory_space<vmem>>, %arg6: memref<1x128xf32, #tpu.memory_space<vmem>>, %arg7: memref<128x128xbf16, #tpu.memory_space<vmem>>, %arg8: memref<32x128xf32, #tpu.memory_space<vmem>>) attributes {dimension_semantics = [#tpu.dimension_semantics<arbitrary>], iteration_bounds = array<i64: 1>, scalar_prefetch = 0 : i64, scratch_operands = 0 : i64, tpu.core_type = #tpu.core_type<tc>, window_params = [{pipeline_mode = #tpu.pipeline_mode<synchronous>, transform_indices = @transform_0, window_bounds = array<i64: 32, 64>}, {pipeline_mode = #tpu.pipeline_mode<synchronous>, transform_indices = @transform_1, window_bounds = array<i64: 32, 32>}, {pipeline_mode = #tpu.pipeline_mode<synchronous>, transform_indices = @transform_2, window_bounds = array<i64: 64, 512>}, {pipeline_mode = #tpu.pipeline_mode<synchronous>, transform_indices = @transform_3, window_bounds = array<i64: 1, 512>}, {pipeline_mode = #tpu.pipeline_mode<synchronous>, transform_indices = @transform_4, window_bounds = array<i64: 512, 128>}, {pipeline_mode = #tpu.pipeline_mode<synchronous>, transform_indices = @transform_5, window_bounds = array<i64: 1, 128>}, {pipeline_mode = #tpu.pipeline_mode<synchronous>, transform_indices = @transform_6, window_bounds = array<i64: 128, 128>}, {pipeline_mode = #tpu.pipeline_mode<synchronous>, transform_indices = @transform_7, window_bounds = array<i64: 32, 128>}]} {
    %c0 = arith.constant 0 : index
    %c0_0 = arith.constant 0 : index
    %0 = vector.load %arg2[%c0, %c0_0] : memref<32x32xbf16, #tpu.memory_space<vmem>>, vector<32x32xbf16>
    %c0_1 = arith.constant 0 : index
    %c0_2 = arith.constant 0 : index
    %1 = vector.load %arg1[%c0_1, %c0_2] : memref<32x64xbf16, #tpu.memory_space<vmem>>, vector<32x64xbf16>
    %cst = arith.constant dense<0.000000e+00> : vector<32x64xf32>
    %2 = tpu.matmul %0, %1, %cst {dimension_numbers = #tpu.dot_dimension_numbers<[1], [0], [0], [1], [0, 0, 1, 1], [], []>} : vector<32x32xbf16>, vector<32x64xbf16>, vector<32x64xf32> -> vector<32x64xf32>
    %3 = arith.truncf %2 : vector<32x64xf32> to vector<32x64xbf16>
    %c0_3 = arith.constant 0 : index
    %c0_4 = arith.constant 0 : index
    %4 = vector.load %arg3[%c0_3, %c0_4] : memref<64x512xbf16, #tpu.memory_space<vmem>>, vector<64x512xbf16>
    %cst_5 = arith.constant dense<0.000000e+00> : vector<32x512xf32>
    %5 = tpu.matmul %3, %4, %cst_5 {dimension_numbers = #tpu.dot_dimension_numbers<[1], [0], [0], [1], [0, 0, 1, 1], [], []>} : vector<32x64xbf16>, vector<64x512xbf16>, vector<32x512xf32> -> vector<32x512xf32>
    %c0_6 = arith.constant 0 : index
    %c0_7 = arith.constant 0 : index
    %6 = vector.load %arg4[%c0_6, %c0_7] : memref<1x512xf32, #tpu.memory_space<vmem>>, vector<1x512xf32>
    %7 = vector.broadcast %6 : vector<1x512xf32> to vector<32x512xf32>
    %8 = arith.addf %5, %7 : vector<32x512xf32>
    %cst_8 = arith.constant 0.000000e+00 : f32
    %9 = vector.broadcast %cst_8 : f32 to vector<32x512xf32>
    %10 = arith.maximumf %8, %9 : vector<32x512xf32>
    %11 = arith.truncf %10 : vector<32x512xf32> to vector<32x512xbf16>
    %c0_9 = arith.constant 0 : index
    %c0_10 = arith.constant 0 : index
    %12 = vector.load %arg5[%c0_9, %c0_10] : memref<512x128xbf16, #tpu.memory_space<vmem>>, vector<512x128xbf16>
    %cst_11 = arith.constant dense<0.000000e+00> : vector<32x128xf32>
    %13 = tpu.matmul %11, %12, %cst_11 {dimension_numbers = #tpu.dot_dimension_numbers<[1], [0], [0], [1], [0, 0, 1, 1], [], []>} : vector<32x512xbf16>, vector<512x128xbf16>, vector<32x128xf32> -> vector<32x128xf32>
    %14 = arith.truncf %13 : vector<32x128xf32> to vector<32x128xbf16>
    %cst_12 = arith.constant dense<0.000000e+00> : vector<32x128xf32>
    %15 = tpu.matmul %0, %14, %cst_12 {dimension_numbers = #tpu.dot_dimension_numbers<[1], [0], [0], [1], [0, 0, 1, 1], [], []>} : vector<32x32xbf16>, vector<32x128xbf16>, vector<32x128xf32> -> vector<32x128xf32>
    %c0_13 = arith.constant 0 : index
    %c0_14 = arith.constant 0 : index
    %16 = vector.load %arg6[%c0_13, %c0_14] : memref<1x128xf32, #tpu.memory_space<vmem>>, vector<1x128xf32>
    %17 = vector.broadcast %16 : vector<1x128xf32> to vector<32x128xf32>
    %18 = arith.addf %15, %17 : vector<32x128xf32>
    %cst_15 = arith.constant dense<0xFF800000> : vector<32xf32>
    %19 = vector.multi_reduction <maximumf>, %18, %cst_15 [1] : vector<32x128xf32> to vector<32xf32>
    %20 = vector.shape_cast %19 : vector<32xf32> to vector<32x1xf32>
    %21 = vector.broadcast %20 : vector<32x1xf32> to vector<32x128xf32>
    %22 = arith.subf %18, %21 : vector<32x128xf32>
    %23 = math.exp %22 : vector<32x128xf32>
    %24 = arith.truncf %23 : vector<32x128xf32> to vector<32x128xbf16>
    %c0_16 = arith.constant 0 : index
    %c0_17 = arith.constant 0 : index
    %25 = vector.load %arg7[%c0_16, %c0_17] : memref<128x128xbf16, #tpu.memory_space<vmem>>, vector<128x128xbf16>
    %cst_18 = arith.constant dense<0.000000e+00> : vector<32x128xf32>
    %26 = tpu.matmul %24, %25, %cst_18 {dimension_numbers = #tpu.dot_dimension_numbers<[1], [0], [0], [1], [0, 0, 1, 1], [], []>} : vector<32x128xbf16>, vector<128x128xbf16>, vector<32x128xf32> -> vector<32x128xf32>
    %27 = vector.broadcast %20 : vector<32x1xf32> to vector<32x128xf32>
    %28 = arith.subf %18, %27 : vector<32x128xf32>
    %29 = math.log %26 : vector<32x128xf32>
    %30 = arith.subf %28, %29 : vector<32x128xf32>
    %c0_19 = arith.constant 0 : index
    %c0_20 = arith.constant 0 : index
    %31 = vector.load %arg8[%c0_19, %c0_20] : memref<32x128xf32, #tpu.memory_space<vmem>>, vector<32x128xf32>
    tpu.vector_store %arg8[%c0_19, %c0_20], %30 {strides = array<i32>} : memref<32x128xf32, #tpu.memory_space<vmem>>, vector<32x128xf32>,
    return
  }
  func.func @transform_0(%arg0: i32) -> (i32, i32) {
    %c0_i32 = arith.constant 0 : i32
    %c0_i32_0 = arith.constant 0 : i32
    %c0_i32_1 = arith.constant 0 : i32
    return %c0_i32, %c0_i32_0 : i32, i32
  }
  func.func @transform_1(%arg0: i32) -> (i32, i32) {
    %c0_i32 = arith.constant 0 : i32
    %c0_i32_0 = arith.constant 0 : i32
    %c0_i32_1 = arith.constant 0 : i32
    return %c0_i32, %c0_i32_0 : i32, i32
  }
  func.func @transform_2(%arg0: i32) -> (i32, i32) {
    %c0_i32 = arith.constant 0 : i32
    %c0_i32_0 = arith.constant 0 : i32
    %c0_i32_1 = arith.constant 0 : i32
    return %c0_i32, %c0_i32_0 : i32, i32
  }
  func.func @transform_3(%arg0: i32) -> (i32, i32) {
    %c0_i32 = arith.constant 0 : i32
    %c0_i32_0 = arith.constant 0 : i32
    %c0_i32_1 = arith.constant 0 : i32
    return %c0_i32, %c0_i32_0 : i32, i32
  }
  func.func @transform_4(%arg0: i32) -> (i32, i32) {
    %c0_i32 = arith.constant 0 : i32
    %c0_i32_0 = arith.constant 0 : i32
    %c0_i32_1 = arith.constant 0 : i32
    return %c0_i32, %c0_i32_0 : i32, i32
  }
  func.func @transform_5(%arg0: i32) -> (i32, i32) {
    %c0_i32 = arith.constant 0 : i32
    %c0_i32_0 = arith.constant 0 : i32
    %c0_i32_1 = arith.constant 0 : i32
    return %c0_i32, %c0_i32_0 : i32, i32
  }
  func.func @transform_6(%arg0: i32) -> (i32, i32) {
    %c0_i32 = arith.constant 0 : i32
    %c0_i32_0 = arith.constant 0 : i32
    %c0_i32_1 = arith.constant 0 : i32
    return %c0_i32, %c0_i32_0 : i32, i32
  }
  func.func @transform_7(%arg0: i32) -> (i32, i32) {
    %c0_i32 = arith.constant 0 : i32
    %c0_i32_0 = arith.constant 0 : i32
    %c0_i32_1 = arith.constant 0 : i32
    return %c0_i32, %c0_i32_0 : i32, i32
  }
}

</mosaic_0001>

<bundles_post_ra>
// kernel: forward.1
= control target key start
LH: loop header
LB: loop body
LE: loop exit
PB: predicated region body
PF: predicated region fallthrough
CT: control target
= control target key end

     0   :  { %vm57_vm0 = vcmask 261120   ;;  %v1201_v20 = vmov 0   ;;  %vm233_vm1 = vcmask 523264   ;;  %v133_v59 = vlaneseq  ;;  %s1456_s0 = inlined_call_operand.vmem [shape: bf16[32,64], index: 0, kind: input, shape index: {}]   ;;  %s1457_s1 = inlined_call_operand.vmem [shape: bf16[32,32], index: 1, kind: input, shape index: {}]   ;;  %s1458_s2 = inlined_call_operand.vmem [shape: bf16[64,512], index: 2, kind: input, shape index: {}]   ;;  %s1459_s4 = inlined_call_operand.vmem [shape: bf16[512,128], index: 4, kind: input, shape index: {}]   ;;  %s1460_s3 = inlined_call_operand.vmem [shape: f32[1,512], index: 3, kind: input, shape index: {}]   ;;  %s1461_s6 = inlined_call_operand.vmem [shape: bf16[128,128], index: 6, kind: input, shape index: {}]   ;;  %s1462_s5 = inlined_call_operand.vmem [shape: f32[1,128], index: 5, kind: input, shape index: {}]   ;;  %s1463_s7 = inlined_call_operand.vmem [shape: f32[32,128], index: 7, kind: output, shape index: {}]  }
   0x1   :  { %v1117_v0 = vld [vmem:[%s1456_s0] sm:$0xff]   ;;  %v1118_v1 = vld [vmem:[%s1456_s0 + $0x8] sm:$0xff]   ;;  %325 = vmatprep.mubr.bf16.mxu0 %v1201_v20  ;;  %v1153_v35 = vld [vmem:[%s1459_s4 + $0x50] sm:$0xff]  }
   0x2   :  { %1080 = vmatprep.subr.bf16.mxu1 %v1117_v0  ;;  %v1251_v2 = vld [vmem:[%s1457_s1] sm:$0xff]   ;;  %v1258_v3 = vld [vmem:[%s1457_s1 + $0x8] sm:$0xff]   ;;  %v1154_v36 = vld [vmem:[%s1459_s4 + $0xd0] sm:$0xff]   ;;  %v134_v60 = vshrl.u32 %v133_v59, 7 }
   0x3   :  { %1081 = vmatpush3.bf16.msra.mxu1 %v1117_v0  ;;  %1084 = vmatprep.mubr.msk.bf16.mxu1 %vm57_vm0, %v1251_v2  ;;  %v1123_v4 = vld [vmem:[%s1458_s2 + $0x4] ss:$16 sps:$4 sm:$0xff]   ;;  %v1124_v5 = vld [vmem:[%s1458_s2 + $0xc] ss:$16 sps:$4 sm:$0xff]   ;;  %v1126_v6 = vld [vmem:[%s1458_s2 + $0x8] ss:$16 sps:$4 sm:$0xff]  }
   0x4   :  { %1082 = vmatprep.subr.bf16.mxu1 %v1118_v1  ;;  %v1121_v7 = vld [vmem:[%s1458_s2] ss:$16 sps:$4 sm:$0xff]   ;;  %v1129_v8 = vld [vmem:[%s1458_s2 + $0x24] ss:$16 sps:$4 sm:$0xff]   ;;  %293 = vmatprep.subr.bf16.mxu0 %v1124_v5  ;;  %v1130_v9 = vld [vmem:[%s1458_s2 + $0x2c] ss:$16 sps:$4 sm:$0xff]  }
   0x5   :  { %294 = vmatpush1.bf16.msra.mxu0 %v1126_v6  ;;  %v1132_v10 = vld [vmem:[%s1458_s2 + $0x28] ss:$16 sps:$4 sm:$0xff]   ;;  %v1127_v11 = vld [vmem:[%s1458_s2 + $0x20] ss:$16 sps:$4 sm:$0xff]   ;;  %v1135_v12 = vld [vmem:[%s1458_s2 + $0x44] ss:$16 sps:$4 sm:$0xff]  }
   0x6   :  { %295 = vmatprep.subr.bf16.mxu0 %v1130_v9  ;;  %v1136_v13 = vld [vmem:[%s1458_s2 + $0x4c] ss:$16 sps:$4 sm:$0xff]   ;;  %v1138_v14 = vld [vmem:[%s1458_s2 + $0x48] ss:$16 sps:$4 sm:$0xff]   ;;  %v1133_v15 = vld [vmem:[%s1458_s2 + $0x40] ss:$16 sps:$4 sm:$0xff]  }
   0x7   :  { %1083 = vmatpush3.bf16.msra.mxu1 %v1118_v1  ;;  %v1141_v16 = vld [vmem:[%s1458_s2 + $0x64] ss:$16 sps:$4 sm:$0xff]   ;;  %v1142_v17 = vld [vmem:[%s1458_s2 + $0x6c] ss:$16 sps:$4 sm:$0xff]   ;;  %v1139_v18 = vld [vmem:[%s1458_s2 + $0x60] ss:$16 sps:$4 sm:$0xff]  }
   0x8   :  { %240 = vmatprep.subr.bf16.mxu1 %v1123_v4  ;;  %v1144_v19 = vld [vmem:[%s1458_s2 + $0x68] ss:$16 sps:$4 sm:$0xff]   ;;  %v1145_v21 = vld [vmem:[%s1459_s4 + $0x40] sm:$0xff]   ;;  %v1155_v37 = vld [vmem:[%s1459_s4 + $0x10] sm:$0xff]   ;;  %v135_v61 = vsub.s32 0, %v134_v60  ;;  %v143_v62 = vsub.s32 2, %v134_v60 }
   0x9   :  { %296 = vmatpush1.bf16.msra.mxu0 %v1132_v10  ;;  %v1146_v22 = vld [vmem:[%s1459_s4 + $0xc0] sm:$0xff]   ;;  %v1149_v31 = vld [vmem:[%s1459_s4 + $0x48] sm:$0xff]   ;;  %v1156_v38 = vld [vmem:[%s1459_s4 + $0x90] sm:$0xff]   ;;  %v139_v0 = vsub.s32 1, %v134_v60  ;;  %v147_v1 = vsub.s32 3, %v134_v60 }
   0xa   :  { %1085 = vmatmul.mubr.msk.bf16.vlgmr.msra.gmra.mrb[0].mxu1 %vm57_vm0, %v1258_v3  ;;  %297 = vmatprep.subr.bf16.mxu0 %v1136_v13  ;;  %v1147_v29 = vld [vmem:[%s1459_s4] sm:$0xff]   ;;  %v1150_v32 = vld [vmem:[%s1459_s4 + $0xc8] sm:$0xff]   ;;  %v1157_v39 = vld [vmem:[%s1459_s4 + $0x58] sm:$0xff]  }
   0xb   :  { %241 = vmatpush1.bf16.msra.mxu1 %v1121_v7  ;;  %272 = vmatprep.mubr.bf16.mxu1 %v1201_v20  ;;  %v1148_v30 = vld [vmem:[%s1459_s4 + $0x80] sm:$0xff]   ;;  %v1151_v33 = vld [vmem:[%s1459_s4 + $0x8] sm:$0xff]   ;;  %v1158_v40 = vld [vmem:[%s1459_s4 + $0xd8] sm:$0xff]  }
   0xc   :  { %242 = vmatprep.subr.bf16.mxu1 %v1129_v8  ;;  %v1152_v34 = vld [vmem:[%s1459_s4 + $0x88] sm:$0xff]   ;;  %v1159_v41 = vld [vmem:[%s1459_s4 + $0x18] sm:$0xff]   ;;  %v1161_v43 = vld [vmem:[%s1459_s4 + $0x60] sm:$0xff]  }
   0xd   :  { %298 = vmatpush1.bf16.msra.mxu0 %v1138_v14  ;;  %v1160_v42 = vld [vmem:[%s1459_s4 + $0x98] sm:$0xff]   ;;  %v1162_v44 = vld [vmem:[%s1459_s4 + $0xe0] sm:$0xff]   ;;  %v1165_v47 = vld [vmem:[%s1459_s4 + $0x68] sm:$0xff]  }
   0xe   :  { %299 = vmatprep.subr.bf16.mxu0 %v1142_v17  ;;  %v1163_v45 = vld [vmem:[%s1459_s4 + $0x20] sm:$0xff]   ;;  %v1166_v48 = vld [vmem:[%s1459_s4 + $0xe8] sm:$0xff]   ;;  %v1169_v51 = vld [vmem:[%s1459_s4 + $0x70] sm:$0xff]  }
   0xf   :  { %243 = vmatpush1.bf16.msra.mxu1 %v1127_v11  ;;  %v1164_v46 = vld [vmem:[%s1459_s4 + $0xa0] sm:$0xff]   ;;  %v1167_v49 = vld [vmem:[%s1459_s4 + $0x28] sm:$0xff]   ;;  %v1170_v52 = vld [vmem:[%s1459_s4 + $0xf0] sm:$0xff]  }
  0x10   :  { %244 = vmatprep.subr.bf16.mxu1 %v1135_v12  ;;  %v1168_v50 = vld [vmem:[%s1459_s4 + $0xa8] sm:$0xff]   ;;  %v1171_v53 = vld [vmem:[%s1459_s4 + $0x30] sm:$0xff]   ;;  %v1173_v55 = vld [vmem:[%s1459_s4 + $0x78] sm:$0xff]  }
  0x11   :  { %300 = vmatpush1.bf16.msra.mxu0 %v1144_v19  ;;  %v1172_v54 = vld [vmem:[%s1459_s4 + $0xb0] sm:$0xff]   ;;  %v1174_v56 = vld [vmem:[%s1459_s4 + $0xf8] sm:$0xff]   ;;  %v131_v63 = vld [vmem:[%s1460_s3] sm:$0xf] }
  0x12   :  { %1038 = vmatprep.subr.bf16.mxu0 %v1146_v22  ;;  %v1175_v57 = vld [vmem:[%s1459_s4 + $0x38] sm:$0xff]   ;;  %v136_v4 = vrot.slane %v131_v63, %v135_v61  ;;  %v144_v5 = vrot.slane %v131_v63, %v143_v62  ;;  %v140_v6 = vrot.slane %v131_v63, %v139_v0  ;;  %v148_v7 = vrot.slane %v131_v63, %v147_v1 }
  0x13   :  { %245 = vmatpush1.bf16.msra.mxu1 %v1133_v15  ;;  %v1176_v58 = vld [vmem:[%s1459_s4 + $0xb8] sm:$0xff]  }
  0x14   :  { %246 = vmatprep.subr.bf16.mxu1 %v1141_v16 }
  0x17   :  { %247 = vmatpush1.bf16.msra.mxu1 %v1139_v18 }
  0x18   :  { %1010 = vmatprep.subr.bf16.mxu1 %v1145_v21 }
  0xdd   :  { %v1086_v23 = vpop.f32.mrb[0].mxu1 }
  0xde   :  { %v98_v24 = vpop.f32.mrb[1].mxu1 }
  0xdf   :  { %v1087_v25 = vpop.f32.mrb[2].mxu1 }
  0xe0   :  { %v114_v26 = vpack.c.bf16 %v1087_v25, %v1086_v23  ;;  %v101_v27 = vpop.f32.mrb[3].mxu1 }
  0xe1   :  { %v113_v28 = vpack.c.bf16 %v101_v27, %v98_v24 }
  0xe3   :  { %959 = vmatmul.mubr.msk.bf16.vlgmr.msra.gmra.mrb[4].mxu1 %vm233_vm1, %v113_v28  ;;  %961 = vmatmul.mubr.msk.bf16.vlgmr.msra.gmra.mrb[0].mxu0 %vm233_vm1, %v113_v28 }
  0xe4   :  { %282 = vmatprep.mubr.bf16.mxu1 %v1201_v20  ;;  %335 = vmatprep.mubr.bf16.mxu0 %v1201_v20 }
  0xe5   :  { %1011 = vmatpush3.bf16.msra.mxu1 %v1147_v29  ;;  %1039 = vmatpush3.bf16.msra.mxu0 %v1148_v30 }
  0xe6   :  { %1012 = vmatprep.subr.bf16.mxu1 %v1149_v31  ;;  %1040 = vmatprep.subr.bf16.mxu0 %v1150_v32 }
  0xe9   :  { %1013 = vmatpush3.bf16.msra.mxu1 %v1151_v33  ;;  %1041 = vmatpush3.bf16.msra.mxu0 %v1152_v34 }
  0xea   :  { %1014 = vmatprep.subr.bf16.mxu1 %v1153_v35  ;;  %1042 = vmatprep.subr.bf16.mxu0 %v1154_v36 }
  0xeb   :  { %960 = vmatmul.mubr.msk.bf16.gmra.mrb[8].mxu1 %vm233_vm1, %v114_v26  ;;  %962 = vmatmul.mubr.msk.bf16.gmra.mrb[4].mxu0 %vm233_vm1, %v114_v26 }
  0xed   :  { %1015 = vmatpush3.bf16.msra.mxu1 %v1155_v37  ;;  %1043 = vmatpush3.bf16.msra.mxu0 %v1156_v38 }
  0xee   :  { %1016 = vmatprep.subr.bf16.mxu1 %v1157_v39  ;;  %1044 = vmatprep.subr.bf16.mxu0 %v1158_v40 }
  0xf1   :  { %1017 = vmatpush3.bf16.msra.mxu1 %v1159_v41  ;;  %1045 = vmatpush3.bf16.msra.mxu0 %v1160_v42 }
  0xf2   :  { %1018 = vmatprep.subr.bf16.mxu1 %v1161_v43  ;;  %1046 = vmatprep.subr.bf16.mxu0 %v1162_v44 }
  0xf5   :  { %1019 = vmatpush3.bf16.msra.mxu1 %v1163_v45  ;;  %1047 = vmatpush3.bf16.msra.mxu0 %v1164_v46 }
  0xf6   :  { %1020 = vmatprep.subr.bf16.mxu1 %v1165_v47  ;;  %1048 = vmatprep.subr.bf16.mxu0 %v1166_v48 }
  0xf9   :  { %1021 = vmatpush3.bf16.msra.mxu1 %v1167_v49  ;;  %1049 = vmatpush3.bf16.msra.mxu0 %v1168_v50 }
  0xfa   :  { %1022 = vmatprep.subr.bf16.mxu1 %v1169_v51  ;;  %1050 = vmatprep.subr.bf16.mxu0 %v1170_v52 }
  0xfd   :  { %1023 = vmatpush3.bf16.msra.mxu1 %v1171_v53  ;;  %1051 = vmatpush3.bf16.msra.mxu0 %v1172_v54 }
  0xfe   :  { %1024 = vmatprep.subr.bf16.mxu1 %v1173_v55  ;;  %1052 = vmatprep.subr.bf16.mxu0 %v1174_v56 }
 0x101   :  { %1025 = vmatpush3.bf16.msra.mxu1 %v1175_v57  ;;  %1053 = vmatpush3.bf16.msra.mxu0 %v1176_v58 }
 0x1b6   :  { %v274_v8 = vpop.f32.mrb[4].mxu1  ;;  %v327_v9 = vpop.f32.mrb[0].mxu0 }
 0x1b7   :  { %v275_v10 = vadd.f32 %v274_v8, %v136_v4  ;;  %v328_v11 = vadd.f32 %v327_v9, %v144_v5  ;;  %v276_v12 = vpop.f32.mrb[5].mxu1  ;;  %v329_v13 = vpop.f32.mrb[1].mxu0 }
 0x1b8   :  { %v277_v14 = vadd.f32 %v276_v12, %v140_v6  ;;  %v330_v15 = vadd.f32 %v329_v13, %v148_v7  ;;  %v278_v16 = vpop.f32.mrb[6].mxu1  ;;  %v331_v17 = vpop.f32.mrb[2].mxu0 }
 0x1b9   :  { %v279_v18 = vadd.f32 %v278_v16, %v136_v4  ;;  %v332_v19 = vadd.f32 %v331_v17, %v144_v5  ;;  %v280_v20 = vpop.f32.mrb[7].mxu1  ;;  %v333_v21 = vpop.f32.mrb[3].mxu0  ;;  %v346_v24 = vmax.f32 %v275_v10, 0.0  ;;  %v348_v25 = vmax.f32 %v328_v11, 0.0 }
 0x1ba   :  { %v281_v22 = vadd.f32 %v280_v20, %v140_v6  ;;  %v334_v23 = vadd.f32 %v333_v21, %v148_v7  ;;  %v347_v28 = vmax.f32 %v277_v14, 0.0  ;;  %v349_v29 = vmax.f32 %v330_v15, 0.0 }
 0x1bb   :  { %v350_v26 = vmax.f32 %v279_v18, 0.0  ;;  %v352_v27 = vmax.f32 %v332_v19, 0.0 }
 0x1bc   :  { %v351_v30 = vmax.f32 %v281_v22, 0.0  ;;  %v353_v31 = vmax.f32 %v334_v23, 0.0 }
 0x1bd   :  { %v362_v32 = vpack.c.bf16 %v350_v26, %v346_v24  ;;  %v364_v33 = vpack.c.bf16 %v352_v27, %v348_v25 }
 0x1be   :  { %v363_v34 = vpack.c.bf16 %v351_v30, %v347_v28  ;;  %v365_v35 = vpack.c.bf16 %v353_v31, %v349_v29  ;;  %v284_v36 = vpop.f32.mrb[8].mxu1  ;;  %v337_v37 = vpop.f32.mrb[4].mxu0  ;;  %v1177_v31 = vld [vmem:[%s1461_s6] sm:$0xff]  }
 0x1bf   :  { %v285_v38 = vadd.f32 %v284_v36, %v136_v4  ;;  %v338_v39 = vadd.f32 %v337_v37, %v144_v5  ;;  %v286_v40 = vpop.f32.mrb[9].mxu1  ;;  %v339_v41 = vpop.f32.mrb[5].mxu0  ;;  %1096 = vmatprep.subr.bf16.mxu0 %v1177_v31 }
 0x1c0   :  { %v287_v42 = vadd.f32 %v286_v40, %v140_v6  ;;  %v340_v43 = vadd.f32 %v339_v41, %v148_v7  ;;  %v288_v44 = vpop.f32.mrb[10].mxu1  ;;  %v341_v45 = vpop.f32.mrb[6].mxu0  ;;  %658 = vmatprep.mubr.bf16.mxu1 %v363_v34  ;;  %707 = vmatprep.mubr.bf16.mxu0 %v365_v35 }
 0x1c1   :  { %v289_v46 = vadd.f32 %v288_v44, %v136_v4  ;;  %v342_v47 = vadd.f32 %v341_v45, %v144_v5  ;;  %v290_v48 = vpop.f32.mrb[11].mxu1  ;;  %v343_v49 = vpop.f32.mrb[7].mxu0  ;;  %659 = vmatmul.mubr.bf16.vlgmr.msra.gmra.mrb[12].mxu1 %v362_v32  ;;  %708 = vmatmul.mubr.bf16.vlgmr.msra.gmra.mrb[8].mxu0 %v364_v33  ;;  %v354_v52 = vmax.f32 %v285_v38, 0.0  ;;  %v356_v53 = vmax.f32 %v338_v39, 0.0  ;;  %v1178_v32 = vld [vmem:[%s1461_s6 + $0x8] sm:$0xff]   ;;  %v1179_v33 = vld [vmem:[%s1461_s6 + $0x10] sm:$0xff]  }
 0x1c2   :  { %v291_v50 = vadd.f32 %v290_v48, %v140_v6  ;;  %v344_v51 = vadd.f32 %v343_v49, %v148_v7  ;;  %v355_v56 = vmax.f32 %v287_v42, 0.0  ;;  %v357_v57 = vmax.f32 %v340_v43, 0.0  ;;  %1097 = vmatpush3.bf16.msra.mxu0 %v1177_v31  ;;  %v1180_v42 = vld [vmem:[%s1461_s6 + $0x18] sm:$0xff]   ;;  %v1181_v43 = vld [vmem:[%s1461_s6 + $0x20] sm:$0xff]   ;;  %v1182_v44 = vld [vmem:[%s1461_s6 + $0x28] sm:$0xff]  }
 0x1c3   :  { %v358_v54 = vmax.f32 %v289_v46, 0.0  ;;  %v360_v55 = vmax.f32 %v342_v47, 0.0  ;;  %1098 = vmatprep.subr.bf16.mxu0 %v1178_v32  ;;  %v1183_v45 = vld [vmem:[%s1461_s6 + $0x30] sm:$0xff]   ;;  %v1184_v46 = vld [vmem:[%s1461_s6 + $0x38] sm:$0xff]  }
 0x1c4   :  { %v359_v58 = vmax.f32 %v291_v50, 0.0  ;;  %v361_v59 = vmax.f32 %v344_v51, 0.0 }
 0x1c5   :  { %v366_v60 = vpack.c.bf16 %v358_v54, %v354_v52  ;;  %v368_v61 = vpack.c.bf16 %v360_v55, %v356_v53 }
 0x1c6   :  { %v367_v62 = vpack.c.bf16 %v359_v58, %v355_v56  ;;  %v369_v63 = vpack.c.bf16 %v361_v59, %v357_v57  ;;  %1099 = vmatpush3.bf16.msra.mxu0 %v1178_v32 }
 0x1c7   :  { %1100 = vmatprep.subr.bf16.mxu0 %v1179_v33 }
 0x1c8   :  { %666 = vmatprep.mubr.bf16.mxu1 %v367_v62  ;;  %715 = vmatprep.mubr.bf16.mxu0 %v369_v63 }
 0x1c9   :  { %667 = vmatmul.mubr.bf16.gmra.mrb[16].mxu1 %v366_v60  ;;  %716 = vmatmul.mubr.bf16.gmra.mrb[12].mxu0 %v368_v61 }
 0x1ca   :  { %1092 = vmatprep.mubr.msk.bf16.mxu1 %vm57_vm0, %v1251_v2  ;;  %1101 = vmatpush3.bf16.msra.mxu0 %v1179_v33 }
 0x1cb   :  { %1102 = vmatprep.subr.bf16.mxu0 %v1180_v42 }
 0x1ce   :  { %1103 = vmatpush3.bf16.msra.mxu0 %v1180_v42 }
 0x1cf   :  { %1104 = vmatprep.subr.bf16.mxu0 %v1181_v43 }
 0x1d2   :  { %1105 = vmatpush3.bf16.msra.mxu0 %v1181_v43 }
 0x1d3   :  { %1106 = vmatprep.subr.bf16.mxu0 %v1182_v44 }
 0x1d6   :  { %1107 = vmatpush3.bf16.msra.mxu0 %v1182_v44 }
 0x1d7   :  { %1108 = vmatprep.subr.bf16.mxu0 %v1183_v45 }
 0x1da   :  { %1109 = vmatpush3.bf16.msra.mxu0 %v1183_v45 }
 0x1db   :  { %1110 = vmatprep.subr.bf16.mxu0 %v1184_v46 }
 0x1de   :  { %1111 = vmatpush3.bf16.msra.mxu0 %v1184_v46 }
 0x294   :  { %v1026_v0 = vpop.f32.mrb[12].mxu1  ;;  %v1054_v1 = vpop.f32.mrb[8].mxu0 }
 0x295   :  { %v1027_v4 = vpop.f32.mrb[13].mxu1  ;;  %v1055_v5 = vpop.f32.mrb[9].mxu0 }
 0x296   :  { %v1028_v6 = vadd.f32 %v1027_v4, %v1026_v0  ;;  %v1056_v7 = vadd.f32 %v1055_v5, %v1054_v1  ;;  %v1029_v8 = vpop.f32.mrb[14].mxu1  ;;  %v1057_v9 = vpop.f32.mrb[10].mxu0 }
 0x297   :  { %v1030_v10 = vpop.f32.mrb[15].mxu1  ;;  %v1058_v11 = vpop.f32.mrb[11].mxu0 }
 0x298   :  { %v710_v12 = vadd.f32 %v1056_v7, %v1028_v6  ;;  %v1031_v13 = vadd.f32 %v1030_v10, %v1029_v8  ;;  %v1059_v14 = vadd.f32 %v1058_v11, %v1057_v9 }
 0x29a   :  { %v713_v15 = vadd.f32 %v1059_v14, %v1031_v13 }
 0x29c   :  { %v1032_v16 = vpop.f32.mrb[16].mxu1  ;;  %v1060_v17 = vpop.f32.mrb[12].mxu0  ;;  %v724_v18 = vpack.c.bf16 %v713_v15, %v710_v12 }
 0x29d   :  { %v1033_v19 = vpop.f32.mrb[17].mxu1  ;;  %v1061_v20 = vpop.f32.mrb[13].mxu0 }
 0x29e   :  { %v1034_v2 = vadd.f32 %v1033_v19, %v1032_v16  ;;  %v1062_v21 = vadd.f32 %v1061_v20, %v1060_v17  ;;  %v1035_v22 = vpop.f32.mrb[18].mxu1  ;;  %v1063_v23 = vpop.f32.mrb[14].mxu0  ;;  %1088 = vmatprep.subr.bf16.mxu1 %v724_v18 }
 0x29f   :  { %v1036_v24 = vpop.f32.mrb[19].mxu1  ;;  %v1064_v25 = vpop.f32.mrb[15].mxu0  ;;  %1089 = vmatpush3.bf16.msra.mxu1 %v724_v18 }
 0x2a0   :  { %v718_v26 = vadd.f32 %v1062_v21, %v1034_v2  ;;  %v1037_v27 = vadd.f32 %v1036_v24, %v1035_v22  ;;  %v1065_v28 = vadd.f32 %v1064_v25, %v1063_v23 }
 0x2a2   :  { %v721_v29 = vadd.f32 %v1065_v28, %v1037_v27 }
 0x2a4   :  { %v725_v30 = vpack.c.bf16 %v721_v29, %v718_v26 }
 0x2a6   :  { %1090 = vmatprep.subr.bf16.mxu1 %v725_v30 }
 0x2a7   :  { %1091 = vmatpush3.bf16.msra.mxu1 %v725_v30 }
 0x2aa   :  { %1093 = vmatmul.mubr.msk.bf16.vlgmr.msra.gmra.mrb[20].mxu1 %vm57_vm0, %v1258_v3  ;;  %v995_v3 = vld [vmem:[%s1462_s5] ss:$0 sm:$0xff] }
 0x37d   :  { %v1094_v34 = vpop.f32.mrb[20].mxu1 }
 0x37e   :  { %v776_v35 = vadd.f32 %v1094_v34, %v995_v3  ;;  %v767_v36 = vpop.f32.mrb[21].mxu1 }
 0x37f   :  { %v768_v37 = vadd.f32 %v995_v3, %v767_v36  ;;  %v1095_v38 = vpop.f32.mrb[22].mxu1 }
 0x380   :  { %786 = vmax.xlane.f32.xlu1 %v776_v35  ;;  %v770_v39 = vpop.f32.mrb[23].mxu1  ;;  %v779_v40 = vadd.f32 %v1095_v38, %v995_v3 }
 0x381   :  { %782 = vmax.xlane.f32.xlu0 %v768_v37  ;;  %v771_v41 = vadd.f32 %v995_v3, %v770_v39 }
 0x384   :  { %788 = vmax.xlane.f32.xlu1 %v779_v40 }
 0x385   :  { %784 = vmax.xlane.f32.xlu0 %v771_v41 }
 0x40d   :  { %v787_v47 = vpop.xlane.xlu1 %786 }
 0x40e   :  { %v783_v48 = vpop.xlane.xlu0 %782  ;;  %v792_v50 = vsub.f32 %v776_v35, %v787_v47 }
 0x40f   :  { %v790_v49 = vsub.f32 %v768_v37, %v783_v48 }
 0x410   :  { %v798_v56 = vmul.f32 1.442695, %v792_v50 }
 0x411   :  { %v794_v51 = vmul.f32 1.442695, %v790_v49  ;;  %v789_v52 = vpop.xlane.xlu1 %788 }
 0x412   :  { %v793_v53 = vsub.f32 %v779_v40, %v789_v52  ;;  %v785_v54 = vpop.xlane.xlu0 %784 }
 0x413   :  { %v791_v55 = vsub.f32 %v771_v41, %v785_v54  ;;  %1185 = vpow2.f32 %v794_v51 }
 0x414   :  { %v800_v57 = vmul.f32 1.442695, %v793_v53 }
 0x415   :  { %v796_v58 = vmul.f32 1.442695, %v791_v55 }
 0x416   :  { %1187 = vpow2.f32 %v800_v57 }
 0x417   :  { %1189 = vpow2.f32 %v796_v58 }
 0x418   :  { %1191 = vpow2.f32 %v798_v56 }
 0x41d   :  { %v1186_v59 = vpop.eup %1185 }
 0x420   :  { %v1188_v60 = vpop.eup %1187 }
 0x421   :  { %v1190_v61 = vpop.eup %1189 }
 0x422   :  { %v1192_v62 = vpop.eup %1191  ;;  %v802_v63 = vpack.c.bf16 %v1190_v61, %v1186_v59 }
 0x423   :  { %v803_v0 = vpack.c.bf16 %v1188_v60, %v1192_v62 }
 0x424   :  { %1112 = vmatprep.mubr.bf16.mxu0 %v802_v63 }
 0x425   :  { %1113 = vmatmul.mubr.bf16.vlgmr.msra.gmra.mrb[16].mxu0 %v803_v0 }
 0x4f8   :  { %v1114_v1 = vpop.f32.mrb[16].mxu0 }
 0x4f9   :  { %1193 = vlog2.f32 %v1114_v1  ;;  %v902_v4 = vpop.f32.mrb[17].mxu0 }
 0x4fa   :  { %1195 = vlog2.f32 %v902_v4  ;;  %v1115_v5 = vpop.f32.mrb[18].mxu0 }
 0x4fb   :  { %1197 = vlog2.f32 %v1115_v5  ;;  %v905_v6 = vpop.f32.mrb[19].mxu0 }
 0x4fc   :  { %1199 = vlog2.f32 %v905_v6 }
 0x503   :  { %v1194_v7 = vpop.eup %1193 }
 0x504   :  { %v1196_v8 = vpop.eup %1195  ;;  %v922_v9 = vmul.f32 0.6931472, %v1194_v7 }
 0x505   :  { %v1198_v10 = vpop.eup %1197  ;;  %v918_v11 = vmul.f32 0.6931472, %v1196_v8 }
 0x506   :  { %v1200_v12 = vpop.eup %1199  ;;  %v927_v13 = vsub.f32 %v792_v50, %v922_v9  ;;  %v924_v14 = vmul.f32 0.6931472, %v1198_v10 }
 0x507   :  { %v925_v15 = vsub.f32 %v790_v49, %v918_v11  ;;  %v920_v16 = vmul.f32 0.6931472, %v1200_v12 }
 0x508   :  { %931 = vst [vmem:[%s1463_s7 + $0x10] sm:$0xff] %v927_v13  ;;  %v928_v17 = vsub.f32 %v793_v53, %v924_v14 }
 0x509   :  { %929 = vst [vmem:[%s1463_s7] sm:$0xff] %v925_v15  ;;  %v926_v18 = vsub.f32 %v791_v55, %v920_v16 }
 0x50a   :  { %932 = vst [vmem:[%s1463_s7 + $0x18] sm:$0xff] %v928_v17 }
 0x50b   :  { %930 = vst [vmem:[%s1463_s7 + $0x8] sm:$0xff] %v926_v18 }

</bundles_post_ra>
